<compile_context>
chip_gen: v5e
topology: v5e:2x2
jax: 0.10.0
libtpu: 0.0.40
codegen_flags: <defaults>
</compile_context>

<pallas_src>
import jax
import jax.numpy as jnp
from jax.experimental import pallas as pl
from jax.experimental.pallas import tpu as pltpu

B = 2            # batch
L = 32           # signal length (head expects 32 + 7 features)
LANES = 128      # lane width of the conv / head buffers

DILATIONS = (1, 1, 2, 4, 8, 16, 32)
PADDINGS = (1, 0, 1, 2, 4, 8, 16)


def total_net_kernel(
    cparams_ref,            # SMEM (21,) f32: [w0, w1, bias] per dilated-conv layer
    x_ref,                  # VMEM (B, 32)  f32  raw signal
    m_ref,                  # VMEM (B*8, 5) f32  flattened meta input
    mw1t_ref,               # (5, 32)   bf16  MetaNet.net1 Linear(5,32) W.T
    mb1_ref,                # (1, 32)   f32
    mw2t_ref,               # (32, 128) bf16  MetaNet.net1 Linear(32,7) W.T, lanes>=7 zero
    mb2_ref,                # (1, 128)  f32   lanes>=7 zero
    w3bd_ref,               # (B*16, B*8) bf16  block-diag MetaNet.net2 Linear(8,16)
    b3col_ref,              # (B*16, 1)   f32
    w4bd_ref,               # (B, B*16)   bf16  block-diag MetaNet.net2 Linear(16,1) (bias folded)
    head_w_ref,             # (384, 128) bf16 slab: [wh1_full | wh2.T | fused wh3.T@wh4.T]
    head_b_ref,             # (3, 128)   f32  slab: [bh1' | bh2 | bh34'(+1 folded)]
    o_ref,                  # VMEM (B, 32) f32 output
    xbuf,                   # scratch VMEM (B, 128) f32
):
    f32, bf16 = jnp.float32, jnp.bfloat16
    bsz = x_ref.shape[0]

    # ---------------- build the 128-lane signal buffer in-kernel ----------------
    xbuf[...] = jnp.zeros((bsz, LANES), f32)
    xbuf[:, 0:L] = x_ref[...]
    x128 = xbuf[...]                                           # lanes >= 32 are 0

    lane = jax.lax.broadcasted_iota(jnp.int32, (bsz, LANES), 1)
    mask33 = lane < 33
    mask32 = lane < L

    # ---------------- DilatedNet: 7 dilated k=2 convs, tanh between ----------------
    seq = x128
    lin = L
    for li in range(7):
        d, p = DILATIONS[li], PADDINGS[li]
        lout = lin + 2 * p - d
        w0 = cparams_ref[li * 3 + 0]
        w1 = cparams_ref[li * 3 + 1]
        bb = cparams_ref[li * 3 + 2]
        sh0 = p % LANES                 # out[t] needs s[t - p]
        sh1 = (p - d) % LANES           # out[t] needs s[t + d - p]
        t0 = pltpu.roll(seq, shift=sh0, axis=1) if sh0 else seq
        t1 = pltpu.roll(seq, shift=sh1, axis=1) if sh1 else seq
        # Mask is REQUIRED: lanes >= lout must be exactly zero so the circular
        # rolls of the next layer read the implicit zero padding.
        mask = mask33 if lout == 33 else mask32
        y = jnp.where(mask, w0 * t0 + w1 * t1 + bb, 0.0)
        if li < 6:                      # last conv has no tanh after it
            y = jnp.tanh(y)
        seq = y
        lin = lout

    o128 = seq + x128                   # residual; lanes >= 32 stay exactly zero

    # ---------------- MetaNet ----------------
    m = m_ref[...]                                                       # (B*8, 5)
    y1 = jnp.tanh(jnp.dot(m.astype(bf16), mw1t_ref[...],
                          preferred_element_type=f32) + mb1_ref[...])    # (B*8, 32)
    y2 = (jnp.dot(y1.astype(bf16), mw2t_ref[...],
                  preferred_element_type=f32) + mb2_ref[...])            # (B*8,128); lanes>=7 == 0

    # transpose(1,2) + net2 fused over batch via block-diagonal weights:
    #   g[b*16+k, j]  = sum_s W3[k, s] * y2[b*8+s, j] + b3[k]
    #   met[b, j]     = sum_k W4[0, k] * tanh(g)[b*16+k, j]    (b4 folded into bh1')
    g = (jnp.dot(w3bd_ref[...], y2.astype(bf16),
                 preferred_element_type=f32) + b3col_ref[...])           # (B*16, 128)
    met = jnp.dot(w4bd_ref[...], jnp.tanh(g).astype(bf16),
                  preferred_element_type=f32)                            # (B, 128); valid lanes [0,7)

    # ---------------- head (Dropout = identity at inference) ----------------
    # Merge cat((o, met)) + first Linear into ONE 128-wide dot: place met in lanes
    # [32,39) of the residual buffer (lanes outside [32,39) of the rolled met are
    # discarded by the where, so junk beyond lane 7 of `met` never leaks).
    met_sh = pltpu.roll(met, shift=L, axis=1)
    mmask = jnp.logical_and(lane >= L, lane < L + 7)
    h1in = jnp.where(mmask, met_sh, o128)

    hb = head_b_ref[...]                                                 # (3, 128)
    h1 = jnp.tanh(jnp.dot(h1in.astype(bf16), head_w_ref[0:128, :],
                          preferred_element_type=f32) + hb[0:1, :])
    h2 = jnp.tanh(jnp.dot(h1.astype(bf16), head_w_ref[128:256, :],
                          preferred_element_type=f32) + hb[1:2, :])
    # Fused Linear(128,128)->Linear(128,32) (+1.0 folded into the bias).
    h4 = jnp.dot(h2.astype(bf16), head_w_ref[256:384, :],
                 preferred_element_type=f32) + hb[2:3, :]                # (B, 128)
    o_ref[...] = h4[:, 0:L]


def preprocess_params(params, bsz):
    """One-time conversion of PyTorch-layout params into kernel-ready arrays.

    All transposes, zero-padding, block-diagonal construction, the wh3/wh4 fusion,
    the b4 / +1.0 bias folding and the bf16 casts happen here, once.
    """
    (cparams, w1, b1, w2, b2, w3, b3, w4, b4,
     wh1, bh1, wh2, bh2, wh3, bh3, wh4, bh4) = params
    f32, bf16 = jnp.float32, jnp.bfloat16
    hp = jax.lax.Precision.HIGHEST

    cflat = jnp.asarray(cparams, f32).reshape(-1)                     # (21,)

    # MetaNet.net1
    mw1t = w1.T.astype(bf16)                                          # (5, 32)
    mb1 = b1.reshape(1, 32).astype(f32)
    mw2t = jnp.zeros((32, LANES), f32).at[:, :7].set(w2.T).astype(bf16)
    mb2 = jnp.zeros((1, LANES), f32).at[:, :7].set(b2.reshape(1, 7))

    # MetaNet.net2 as block-diagonal weights (per-batch loop -> exactly 2 matmuls).
    w3bd = jnp.zeros((bsz * 16, bsz * 8), f32)
    w4bd = jnp.zeros((bsz, bsz * 16), f32)
    for b in range(bsz):
        w3bd = w3bd.at[b * 16:(b + 1) * 16, b * 8:(b + 1) * 8].set(w3)
        w4bd = w4bd.at[b:b + 1, b * 16:(b + 1) * 16].set(w4)
    w3bd = w3bd.astype(bf16)
    w4bd = w4bd.astype(bf16)
    b3col = jnp.tile(b3.reshape(16, 1), (bsz, 1)).astype(f32)         # (B*16, 1)

    # Head weight slab (bf16, 384x128):
    #   rows [  0:128): merged h1 weight (rows 0-31 = wh1[:, :32].T, rows 32-38 = wh1[:, 32:].T)
    #   rows [128:256): wh2.T
    #   rows [256:384): fused wh3.T @ wh4.T, lanes >= 32 zero
    wh1_full = jnp.zeros((LANES, LANES), f32)
    wh1_full = wh1_full.at[0:L, :].set(wh1[:, :L].T)
    wh1_full = wh1_full.at[L:L + 7, :].set(wh1[:, L:].T)
    wh34 = jnp.dot(wh3.T, wh4.T, precision=hp)                        # (128, 32)
    wh34_wide = jnp.zeros((LANES, LANES), f32).at[:, :L].set(wh34)
    head_w = jnp.concatenate([wh1_full, wh2.T, wh34_wide], axis=0).astype(bf16)

    # Head bias slab (f32, 3x128):
    #   row 0: bh1 + b4 * sum_j wh1[:, 32+j]   (folds the MetaNet output bias b4)
    #   row 1: bh2
    #   row 2: bh3 @ wh4.T + bh4 + 1.0         (folds the final "+1" of the forward)
    bh1p = bh1 + b4[0] * jnp.sum(wh1[:, L:], axis=1)
    bh34 = jnp.dot(bh3, wh4.T, precision=hp) + bh4 + 1.0              # (32,)
    bh34_wide = jnp.zeros((LANES,), f32).at[:L].set(bh34)
    head_b = jnp.stack([bh1p, bh2, bh34_wide]).astype(f32)            # (3, 128)

    kparams = (cflat, mw1t, mb1, mw2t, mb2, w3bd, b3col, w4bd, head_w, head_b)
    return jax.tree_util.tree_map(jnp.asarray, kparams)


@jax.jit
def total_net_forward(x, met, l, kparams):
    """x: (B, 32) f32, met: (B, 8, 5) f32, l: unused (matches the PyTorch forward)."""
    del l
    bsz = x.shape[0]
    (cflat, mw1t, mb1, mw2t, mb2, w3bd, b3col, w4bd, head_w, head_b) = kparams
    # Block-diagonal MetaNet weights bake the batch size in; guard against mismatch.
    assert w4bd.shape[0] == bsz, "kparams were preprocessed for a different batch size"

    m2d = met.astype(jnp.float32).reshape(bsz * 8, 5)   # row-major flatten, bitcast-free

    vmem = pl.BlockSpec(memory_space=pltpu.MemorySpace.VMEM)
    smem = pl.BlockSpec(memory_space=pltpu.MemorySpace.SMEM)

    args = (cflat, x.astype(jnp.float32), m2d,
            mw1t, mb1, mw2t, mb2, w3bd, b3col, w4bd, head_w, head_b)
    in_specs = [smem] + [vmem] * (len(args) - 1)

    # Gridless, whole-working-set-resident kernel: total footprint < 150 KiB, far
    # below the scoped-VMEM limit on v5e/v6e/v7x; per-grid-step overhead would
    # dominate at this size, so no grid / tiling is introduced.
    # TODO(synk): if this forward is called many times back-to-back, wrap it in a
    # single pallas_call with a grid over calls so weights stay VMEM-resident.
    out = pl.pallas_call(
        total_net_kernel,
        out_shape=jax.ShapeDtypeStruct((bsz, L), jnp.float32),
        in_specs=in_specs,
        out_specs=vmem,
        scratch_shapes=[pltpu.VMEM((bsz, LANES), jnp.float32)],
    )(*args)
    return out


def init_params(key):
    """Deterministic PyTorch-default-style init (uniform +/- 1/sqrt(fan_in))."""
    ks = jax.random.split(key, 16)

    def lin(k, out_dim, in_dim):
        bound = 1.0 / jnp.sqrt(jnp.float32(in_dim))
        kw, kb = jax.random.split(k)
        w = jax.random.uniform(kw, (out_dim, in_dim), jnp.float32, -bound, bound)
        b = jax.random.uniform(kb, (out_dim,), jnp.float32, -bound, bound)
        return w, b

    conv_rows = []
    for i in range(7):                      # Conv1d(1, 1, kernel_size=2): w (1,1,2), b (1,)
        w, b = lin(ks[i], 1, 2)
        conv_rows.append(jnp.concatenate([w.reshape(2), b.reshape(1)]))
    cparams = jnp.stack(conv_rows)          # (7, 3)

    w1, b1 = lin(ks[7], 32, 5)
    w2, b2 = lin(ks[8], 7, 32)
    w3, b3 = lin(ks[9], 16, 8)
    w4, b4 = lin(ks[10], 1, 16)
    wh1, bh1 = lin(ks[11], 128, 39)
    wh2, bh2 = lin(ks[12], 128, 128)
    wh3, bh3 = lin(ks[13], 128, 128)
    wh4, bh4 = lin(ks[14], 32, 128)
    return (cparams, w1, b1, w2, b2, w3, b3, w4, b4,
            wh1, bh1, wh2, bh2, wh3, bh3, wh4, bh4)


def total_net_reference(x, met, params):
    """Pure-JAX reference of the PyTorch forward (eval mode)."""
    (cparams, w1, b1, w2, b2, w3, b3, w4, b4,
     wh1, bh1, wh2, bh2, wh3, bh3, wh4, bh4) = params
    hp = jax.lax.Precision.HIGHEST

    s = x
    for i, (d, p) in enumerate(zip(DILATIONS, PADDINGS)):
        lin_len = s.shape[1]
        sp = jnp.pad(s, ((0, 0), (p, p)))
        lout = lin_len + 2 * p - d
        y = cparams[i, 0] * sp[:, :lout] + cparams[i, 1] * sp[:, d:d + lout] + cparams[i, 2]
        s = jnp.tanh(y) if i < 6 else y
    o = s + x

    y1 = jnp.tanh(jnp.einsum('bsi,oi->bso', met, w1, precision=hp) + b1)
    y2 = jnp.einsum('bso,jo->bsj', y1, w2, precision=hp) + b2
    z = jnp.swapaxes(y2, 1, 2)                                   # (B, 7, 8)
    h = jnp.tanh(jnp.einsum('bjs,ks->bjk', z, w3, precision=hp) + b3)
    mo = (jnp.einsum('bjk,ok->bjo', h, w4, precision=hp) + b4)[..., 0]  # (B, 7)

    c = jnp.concatenate([o, mo], axis=1)
    h1 = jnp.tanh(jnp.dot(c, wh1.T, precision=hp) + bh1)
    h2 = jnp.tanh(jnp.dot(h1, wh2.T, precision=hp) + bh2)
    h3 = jnp.dot(h2, wh3.T, precision=hp) + bh3
    h4 = jnp.dot(h3, wh4.T, precision=hp) + bh4
    return 1.0 + h4


if __name__ == "__main__":
    key = jax.random.PRNGKey(0)
    kx, km, kp = jax.random.split(key, 3)
    x = jax.random.normal(kx, (B, L), jnp.float32)
    met = jax.random.normal(km, (B, 8, 5), jnp.float32)
    l = jnp.full((B,), L, jnp.int32)        # unused by the forward pass

    params = init_params(kp)
    kparams = jax.block_until_ready(preprocess_params(params, B))   # one-time, hoisted

    out = total_net_forward(x, met, l, kparams)
    out = jax.block_until_ready(out)
    assert out.shape == (B, L) and out.dtype == jnp.float32

    ref = jax.block_until_ready(total_net_reference(x, met, params))
    assert jnp.allclose(out, ref, atol=2e-2, rtol=2e-2), (
        f"max abs diff {jnp.max(jnp.abs(out - ref))}")

    print("KERNEL_OK")
</pallas_src>

<mosaic_0001>
module attributes {stable_mosaic.version = 11 : i64} {
  func.func @total_net_kernel(%arg0: memref<21xf32, #tpu.memory_space<smem>>, %arg1: memref<2x32xf32, #tpu.memory_space<vmem>>, %arg2: memref<16x5xf32, #tpu.memory_space<vmem>>, %arg3: memref<5x32xbf16, #tpu.memory_space<vmem>>, %arg4: memref<1x32xf32, #tpu.memory_space<vmem>>, %arg5: memref<32x128xbf16, #tpu.memory_space<vmem>>, %arg6: memref<1x128xf32, #tpu.memory_space<vmem>>, %arg7: memref<32x16xbf16, #tpu.memory_space<vmem>>, %arg8: memref<32x1xf32, #tpu.memory_space<vmem>>, %arg9: memref<2x32xbf16, #tpu.memory_space<vmem>>, %arg10: memref<384x128xbf16, #tpu.memory_space<vmem>>, %arg11: memref<3x128xf32, #tpu.memory_space<vmem>>, %arg12: memref<2x32xf32, #tpu.memory_space<vmem>>, %arg13: memref<2x128xf32, #tpu.memory_space<vmem>>) attributes {dimension_semantics = [], scalar_prefetch = 0 : i64, scratch_operands = 1 : i64, tpu.core_type = #tpu.core_type<tc>} {
    %cst = arith.constant 0.000000e+00 : f32
    %0 = vector.broadcast %cst : f32 to vector<2x128xf32>
    %c0 = arith.constant 0 : index
    %c0_0 = arith.constant 0 : index
    %1 = vector.load %arg13[%c0, %c0_0] : memref<2x128xf32, #tpu.memory_space<vmem>>, vector<2x128xf32>
    tpu.vector_store %arg13[%c0, %c0_0], %0 {strides = array<i32>} : memref<2x128xf32, #tpu.memory_space<vmem>>, vector<2x128xf32>,
    %c0_1 = arith.constant 0 : index
    %c0_2 = arith.constant 0 : index
    %2 = vector.load %arg1[%c0_1, %c0_2] : memref<2x32xf32, #tpu.memory_space<vmem>>, vector<2x32xf32>
    %c0_3 = arith.constant 0 : index
    %c0_4 = arith.constant 0 : index
    %3 = vector.load %arg13[%c0_3, %c0_4] : memref<2x128xf32, #tpu.memory_space<vmem>>, vector<2x32xf32>
    tpu.vector_store %arg13[%c0_3, %c0_4], %2 {strides = array<i32>} : memref<2x128xf32, #tpu.memory_space<vmem>>, vector<2x32xf32>,
    %c0_5 = arith.constant 0 : index
    %c0_6 = arith.constant 0 : index
    %4 = vector.load %arg13[%c0_5, %c0_6] : memref<2x128xf32, #tpu.memory_space<vmem>>, vector<2x128xf32>
    %5 = tpu.iota {dimensions = array<i32: 1>} : vector<2x128xi32>
    %c33_i32 = arith.constant 33 : i32
    %6 = vector.broadcast %c33_i32 : i32 to vector<2x128xi32>
    %7 = arith.cmpi slt, %5, %6 : vector<2x128xi32>
    %c32_i32 = arith.constant 32 : i32
    %8 = vector.broadcast %c32_i32 : i32 to vector<2x128xi32>
    %9 = arith.cmpi slt, %5, %8 : vector<2x128xi32>
    %c0_7 = arith.constant 0 : index
    %10 = memref.load %arg0[%c0_7] : memref<21xf32, #tpu.memory_space<smem>>
    %c1 = arith.constant 1 : index
    %11 = memref.load %arg0[%c1] : memref<21xf32, #tpu.memory_space<smem>>
    %c2 = arith.constant 2 : index
    %12 = memref.load %arg0[%c2] : memref<21xf32, #tpu.memory_space<smem>>
    %c1_i32 = arith.constant 1 : i32
    %13 = tpu.dynamic_rotate %4 by %c1_i32 dim 1 : vector<2x128xf32>, i32 -> vector<2x128xf32>
    %14 = vector.broadcast %10 : f32 to vector<2x128xf32>
    %15 = arith.mulf %14, %13 : vector<2x128xf32>
    %16 = vector.broadcast %11 : f32 to vector<2x128xf32>
    %17 = arith.mulf %16, %4 : vector<2x128xf32>
    %18 = arith.addf %15, %17 : vector<2x128xf32>
    %19 = vector.broadcast %12 : f32 to vector<2x128xf32>
    %20 = arith.addf %18, %19 : vector<2x128xf32>
    %cst_8 = arith.constant 0.000000e+00 : f32
    %21 = vector.broadcast %cst_8 : f32 to vector<2x128xf32>
    %22 = arith.select %7, %20, %21 : vector<2x128xi1>, vector<2x128xf32>
    %23 = math.tanh %22 : vector<2x128xf32>
    %c3 = arith.constant 3 : index
    %24 = memref.load %arg0[%c3] : memref<21xf32, #tpu.memory_space<smem>>
    %c4 = arith.constant 4 : index
    %25 = memref.load %arg0[%c4] : memref<21xf32, #tpu.memory_space<smem>>
    %c5 = arith.constant 5 : index
    %26 = memref.load %arg0[%c5] : memref<21xf32, #tpu.memory_space<smem>>
    %c127_i32 = arith.constant 127 : i32
    %27 = tpu.dynamic_rotate %23 by %c127_i32 dim 1 : vector<2x128xf32>, i32 -> vector<2x128xf32>
    %28 = vector.broadcast %24 : f32 to vector<2x128xf32>
    %29 = arith.mulf %28, %23 : vector<2x128xf32>
    %30 = vector.broadcast %25 : f32 to vector<2x128xf32>
    %31 = arith.mulf %30, %27 : vector<2x128xf32>
    %32 = arith.addf %29, %31 : vector<2x128xf32>
    %33 = vector.broadcast %26 : f32 to vector<2x128xf32>
    %34 = arith.addf %32, %33 : vector<2x128xf32>
    %cst_9 = arith.constant 0.000000e+00 : f32
    %35 = vector.broadcast %cst_9 : f32 to vector<2x128xf32>
    %36 = arith.select %9, %34, %35 : vector<2x128xi1>, vector<2x128xf32>
    %37 = math.tanh %36 : vector<2x128xf32>
    %c6 = arith.constant 6 : index
    %38 = memref.load %arg0[%c6] : memref<21xf32, #tpu.memory_space<smem>>
    %c7 = arith.constant 7 : index
    %39 = memref.load %arg0[%c7] : memref<21xf32, #tpu.memory_space<smem>>
    %c8 = arith.constant 8 : index
    %40 = memref.load %arg0[%c8] : memref<21xf32, #tpu.memory_space<smem>>
    %c1_i32_10 = arith.constant 1 : i32
    %41 = tpu.dynamic_rotate %37 by %c1_i32_10 dim 1 : vector<2x128xf32>, i32 -> vector<2x128xf32>
    %c127_i32_11 = arith.constant 127 : i32
    %42 = tpu.dynamic_rotate %37 by %c127_i32_11 dim 1 : vector<2x128xf32>, i32 -> vector<2x128xf32>
    %43 = vector.broadcast %38 : f32 to vector<2x128xf32>
    %44 = arith.mulf %43, %41 : vector<2x128xf32>
    %45 = vector.broadcast %39 : f32 to vector<2x128xf32>
    %46 = arith.mulf %45, %42 : vector<2x128xf32>
    %47 = arith.addf %44, %46 : vector<2x128xf32>
    %48 = vector.broadcast %40 : f32 to vector<2x128xf32>
    %49 = arith.addf %47, %48 : vector<2x128xf32>
    %cst_12 = arith.constant 0.000000e+00 : f32
    %50 = vector.broadcast %cst_12 : f32 to vector<2x128xf32>
    %51 = arith.select %9, %49, %50 : vector<2x128xi1>, vector<2x128xf32>
    %52 = math.tanh %51 : vector<2x128xf32>
    %c9 = arith.constant 9 : index
    %53 = memref.load %arg0[%c9] : memref<21xf32, #tpu.memory_space<smem>>
    %c10 = arith.constant 10 : index
    %54 = memref.load %arg0[%c10] : memref<21xf32, #tpu.memory_space<smem>>
    %c11 = arith.constant 11 : index
    %55 = memref.load %arg0[%c11] : memref<21xf32, #tpu.memory_space<smem>>
    %c2_i32 = arith.constant 2 : i32
    %56 = tpu.dynamic_rotate %52 by %c2_i32 dim 1 : vector<2x128xf32>, i32 -> vector<2x128xf32>
    %c126_i32 = arith.constant 126 : i32
    %57 = tpu.dynamic_rotate %52 by %c126_i32 dim 1 : vector<2x128xf32>, i32 -> vector<2x128xf32>
    %58 = vector.broadcast %53 : f32 to vector<2x128xf32>
    %59 = arith.mulf %58, %56 : vector<2x128xf32>
    %60 = vector.broadcast %54 : f32 to vector<2x128xf32>
    %61 = arith.mulf %60, %57 : vector<2x128xf32>
    %62 = arith.addf %59, %61 : vector<2x128xf32>
    %63 = vector.broadcast %55 : f32 to vector<2x128xf32>
    %64 = arith.addf %62, %63 : vector<2x128xf32>
    %cst_13 = arith.constant 0.000000e+00 : f32
    %65 = vector.broadcast %cst_13 : f32 to vector<2x128xf32>
    %66 = arith.select %9, %64, %65 : vector<2x128xi1>, vector<2x128xf32>
    %67 = math.tanh %66 : vector<2x128xf32>
    %c12 = arith.constant 12 : index
    %68 = memref.load %arg0[%c12] : memref<21xf32, #tpu.memory_space<smem>>
    %c13 = arith.constant 13 : index
    %69 = memref.load %arg0[%c13] : memref<21xf32, #tpu.memory_space<smem>>
    %c14 = arith.constant 14 : index
    %70 = memref.load %arg0[%c14] : memref<21xf32, #tpu.memory_space<smem>>
    %c4_i32 = arith.constant 4 : i32
    %71 = tpu.dynamic_rotate %67 by %c4_i32 dim 1 : vector<2x128xf32>, i32 -> vector<2x128xf32>
    %c124_i32 = arith.constant 124 : i32
    %72 = tpu.dynamic_rotate %67 by %c124_i32 dim 1 : vector<2x128xf32>, i32 -> vector<2x128xf32>
    %73 = vector.broadcast %68 : f32 to vector<2x128xf32>
    %74 = arith.mulf %73, %71 : vector<2x128xf32>
    %75 = vector.broadcast %69 : f32 to vector<2x128xf32>
    %76 = arith.mulf %75, %72 : vector<2x128xf32>
    %77 = arith.addf %74, %76 : vector<2x128xf32>
    %78 = vector.broadcast %70 : f32 to vector<2x128xf32>
    %79 = arith.addf %77, %78 : vector<2x128xf32>
    %cst_14 = arith.constant 0.000000e+00 : f32
    %80 = vector.broadcast %cst_14 : f32 to vector<2x128xf32>
    %81 = arith.select %9, %79, %80 : vector<2x128xi1>, vector<2x128xf32>
    %82 = math.tanh %81 : vector<2x128xf32>
    %c15 = arith.constant 15 : index
    %83 = memref.load %arg0[%c15] : memref<21xf32, #tpu.memory_space<smem>>
    %c16 = arith.constant 16 : index
    %84 = memref.load %arg0[%c16] : memref<21xf32, #tpu.memory_space<smem>>
    %c17 = arith.constant 17 : index
    %85 = memref.load %arg0[%c17] : memref<21xf32, #tpu.memory_space<smem>>
    %c8_i32 = arith.constant 8 : i32
    %86 = tpu.dynamic_rotate %82 by %c8_i32 dim 1 : vector<2x128xf32>, i32 -> vector<2x128xf32>
    %c120_i32 = arith.constant 120 : i32
    %87 = tpu.dynamic_rotate %82 by %c120_i32 dim 1 : vector<2x128xf32>, i32 -> vector<2x128xf32>
    %88 = vector.broadcast %83 : f32 to vector<2x128xf32>
    %89 = arith.mulf %88, %86 : vector<2x128xf32>
    %90 = vector.broadcast %84 : f32 to vector<2x128xf32>
    %91 = arith.mulf %90, %87 : vector<2x128xf32>
    %92 = arith.addf %89, %91 : vector<2x128xf32>
    %93 = vector.broadcast %85 : f32 to vector<2x128xf32>
    %94 = arith.addf %92, %93 : vector<2x128xf32>
    %cst_15 = arith.constant 0.000000e+00 : f32
    %95 = vector.broadcast %cst_15 : f32 to vector<2x128xf32>
    %96 = arith.select %9, %94, %95 : vector<2x128xi1>, vector<2x128xf32>
    %97 = math.tanh %96 : vector<2x128xf32>
    %c18 = arith.constant 18 : index
    %98 = memref.load %arg0[%c18] : memref<21xf32, #tpu.memory_space<smem>>
    %c19 = arith.constant 19 : index
    %99 = memref.load %arg0[%c19] : memref<21xf32, #tpu.memory_space<smem>>
    %c20 = arith.constant 20 : index
    %100 = memref.load %arg0[%c20] : memref<21xf32, #tpu.memory_space<smem>>
    %c16_i32 = arith.constant 16 : i32
    %101 = tpu.dynamic_rotate %97 by %c16_i32 dim 1 : vector<2x128xf32>, i32 -> vector<2x128xf32>
    %c112_i32 = arith.constant 112 : i32
    %102 = tpu.dynamic_rotate %97 by %c112_i32 dim 1 : vector<2x128xf32>, i32 -> vector<2x128xf32>
    %103 = vector.broadcast %98 : f32 to vector<2x128xf32>
    %104 = arith.mulf %103, %101 : vector<2x128xf32>
    %105 = vector.broadcast %99 : f32 to vector<2x128xf32>
    %106 = arith.mulf %105, %102 : vector<2x128xf32>
    %107 = arith.addf %104, %106 : vector<2x128xf32>
    %108 = vector.broadcast %100 : f32 to vector<2x128xf32>
    %109 = arith.addf %107, %108 : vector<2x128xf32>
    %cst_16 = arith.constant 0.000000e+00 : f32
    %110 = vector.broadcast %cst_16 : f32 to vector<2x128xf32>
    %111 = arith.select %9, %109, %110 : vector<2x128xi1>, vector<2x128xf32>
    %112 = arith.addf %111, %4 : vector<2x128xf32>
    %c0_17 = arith.constant 0 : index
    %c0_18 = arith.constant 0 : index
    %113 = vector.load %arg2[%c0_17, %c0_18] : memref<16x5xf32, #tpu.memory_space<vmem>>, vector<16x5xf32>
    %114 = arith.truncf %113 : vector<16x5xf32> to vector<16x5xbf16>
    %c0_19 = arith.constant 0 : index
    %c0_20 = arith.constant 0 : index
    %115 = vector.load %arg3[%c0_19, %c0_20] : memref<5x32xbf16, #tpu.memory_space<vmem>>, vector<5x32xbf16>
    %cst_21 = arith.constant dense<0.000000e+00> : vector<16x32xf32>
    %116 = tpu.matmul %114, %115, %cst_21 {dimension_numbers = #tpu.dot_dimension_numbers<[1], [0], [0], [1], [0, 0, 1, 1], [], []>} : vector<16x5xbf16>, vector<5x32xbf16>, vector<16x32xf32> -> vector<16x32xf32>
    %c0_22 = arith.constant 0 : index
    %c0_23 = arith.constant 0 : index
    %117 = vector.load %arg4[%c0_22, %c0_23] : memref<1x32xf32, #tpu.memory_space<vmem>>, vector<1x32xf32>
    %118 = vector.broadcast %117 : vector<1x32xf32> to vector<16x32xf32>
    %119 = arith.addf %116, %118 : vector<16x32xf32>
    %120 = math.tanh %119 : vector<16x32xf32>
    %121 = arith.truncf %120 : vector<16x32xf32> to vector<16x32xbf16>
    %c0_24 = arith.constant 0 : index
    %c0_25 = arith.constant 0 : index
    %122 = vector.load %arg5[%c0_24, %c0_25] : memref<32x128xbf16, #tpu.memory_space<vmem>>, vector<32x128xbf16>
    %cst_26 = arith.constant dense<0.000000e+00> : vector<16x128xf32>
    %123 = tpu.matmul %121, %122, %cst_26 {dimension_numbers = #tpu.dot_dimension_numbers<[1], [0], [0], [1], [0, 0, 1, 1], [], []>} : vector<16x32xbf16>, vector<32x128xbf16>, vector<16x128xf32> -> vector<16x128xf32>
    %c0_27 = arith.constant 0 : index
    %c0_28 = arith.constant 0 : index
    %124 = vector.load %arg6[%c0_27, %c0_28] : memref<1x128xf32, #tpu.memory_space<vmem>>, vector<1x128xf32>
    %125 = vector.broadcast %124 : vector<1x128xf32> to vector<16x128xf32>
    %126 = arith.addf %123, %125 : vector<16x128xf32>
    %c0_29 = arith.constant 0 : index
    %c0_30 = arith.constant 0 : index
    %127 = vector.load %arg7[%c0_29, %c0_30] : memref<32x16xbf16, #tpu.memory_space<vmem>>, vector<32x16xbf16>
    %128 = arith.truncf %126 : vector<16x128xf32> to vector<16x128xbf16>
    %cst_31 = arith.constant dense<0.000000e+00> : vector<32x128xf32>
    %129 = tpu.matmul %127, %128, %cst_31 {dimension_numbers = #tpu.dot_dimension_numbers<[1], [0], [0], [1], [0, 0, 1, 1], [], []>} : vector<32x16xbf16>, vector<16x128xbf16>, vector<32x128xf32> -> vector<32x128xf32>
    %c0_32 = arith.constant 0 : index
    %c0_33 = arith.constant 0 : index
    %130 = vector.load %arg8[%c0_32, %c0_33] : memref<32x1xf32, #tpu.memory_space<vmem>>, vector<32x1xf32>
    %131 = vector.broadcast %130 : vector<32x1xf32> to vector<32x128xf32>
    %132 = arith.addf %129, %131 : vector<32x128xf32>
    %c0_34 = arith.constant 0 : index
    %c0_35 = arith.constant 0 : index
    %133 = vector.load %arg9[%c0_34, %c0_35] : memref<2x32xbf16, #tpu.memory_space<vmem>>, vector<2x32xbf16>
    %134 = math.tanh %132 : vector<32x128xf32>
    %135 = arith.truncf %134 : vector<32x128xf32> to vector<32x128xbf16>
    %cst_36 = arith.constant dense<0.000000e+00> : vector<2x128xf32>
    %136 = tpu.matmul %133, %135, %cst_36 {dimension_numbers = #tpu.dot_dimension_numbers<[1], [0], [0], [1], [0, 0, 1, 1], [], []>} : vector<2x32xbf16>, vector<32x128xbf16>, vector<2x128xf32> -> vector<2x128xf32>
    %c32_i32_37 = arith.constant 32 : i32
    %137 = tpu.dynamic_rotate %136 by %c32_i32_37 dim 1 : vector<2x128xf32>, i32 -> vector<2x128xf32>
    %c32_i32_38 = arith.constant 32 : i32
    %138 = vector.broadcast %c32_i32_38 : i32 to vector<2x128xi32>
    %139 = arith.cmpi sge, %5, %138 : vector<2x128xi32>
    %c39_i32 = arith.constant 39 : i32
    %140 = vector.broadcast %c39_i32 : i32 to vector<2x128xi32>
    %141 = arith.cmpi slt, %5, %140 : vector<2x128xi32>
    %142 = arith.andi %139, %141 : vector<2x128xi1>
    %143 = arith.select %142, %137, %112 : vector<2x128xi1>, vector<2x128xf32>
    %c0_39 = arith.constant 0 : index
    %c0_40 = arith.constant 0 : index
    %144 = vector.load %arg11[%c0_39, %c0_40] : memref<3x128xf32, #tpu.memory_space<vmem>>, vector<3x128xf32>
    %145 = arith.truncf %143 : vector<2x128xf32> to vector<2x128xbf16>
    %c0_41 = arith.constant 0 : index
    %c0_42 = arith.constant 0 : index
    %146 = vector.load %arg10[%c0_41, %c0_42] : memref<384x128xbf16, #tpu.memory_space<vmem>>, vector<128x128xbf16>
    %cst_43 = arith.constant dense<0.000000e+00> : vector<2x128xf32>
    %147 = tpu.matmul %145, %146, %cst_43 {dimension_numbers = #tpu.dot_dimension_numbers<[1], [0], [0], [1], [0, 0, 1, 1], [], []>} : vector<2x128xbf16>, vector<128x128xbf16>, vector<2x128xf32> -> vector<2x128xf32>
    %148 = vector.extract_strided_slice %144 {offsets = [0, 0], sizes = [1, 128], strides = [1, 1]} : vector<3x128xf32> to vector<1x128xf32>
    %149 = vector.broadcast %148 : vector<1x128xf32> to vector<2x128xf32>
    %150 = arith.addf %147, %149 : vector<2x128xf32>
    %151 = math.tanh %150 : vector<2x128xf32>
    %152 = arith.truncf %151 : vector<2x128xf32> to vector<2x128xbf16>
    %c128 = arith.constant 128 : index
    %c0_44 = arith.constant 0 : index
    %153 = vector.load %arg10[%c128, %c0_44] : memref<384x128xbf16, #tpu.memory_space<vmem>>, vector<128x128xbf16>
    %cst_45 = arith.constant dense<0.000000e+00> : vector<2x128xf32>
    %154 = tpu.matmul %152, %153, %cst_45 {dimension_numbers = #tpu.dot_dimension_numbers<[1], [0], [0], [1], [0, 0, 1, 1], [], []>} : vector<2x128xbf16>, vector<128x128xbf16>, vector<2x128xf32> -> vector<2x128xf32>
    %155 = vector.extract_strided_slice %144 {offsets = [1, 0], sizes = [1, 128], strides = [1, 1]} : vector<3x128xf32> to vector<1x128xf32>
    %156 = vector.broadcast %155 : vector<1x128xf32> to vector<2x128xf32>
    %157 = arith.addf %154, %156 : vector<2x128xf32>
    %158 = math.tanh %157 : vector<2x128xf32>
    %159 = arith.truncf %158 : vector<2x128xf32> to vector<2x128xbf16>
    %c256 = arith.constant 256 : index
    %c0_46 = arith.constant 0 : index
    %160 = vector.load %arg10[%c256, %c0_46] : memref<384x128xbf16, #tpu.memory_space<vmem>>, vector<128x128xbf16>
    %cst_47 = arith.constant dense<0.000000e+00> : vector<2x128xf32>
    %161 = tpu.matmul %159, %160, %cst_47 {dimension_numbers = #tpu.dot_dimension_numbers<[1], [0], [0], [1], [0, 0, 1, 1], [], []>} : vector<2x128xbf16>, vector<128x128xbf16>, vector<2x128xf32> -> vector<2x128xf32>
    %162 = vector.extract_strided_slice %144 {offsets = [2, 0], sizes = [1, 128], strides = [1, 1]} : vector<3x128xf32> to vector<1x128xf32>
    %163 = vector.broadcast %162 : vector<1x128xf32> to vector<2x128xf32>
    %164 = arith.addf %161, %163 : vector<2x128xf32>
    %165 = vector.extract_strided_slice %164 {offsets = [0, 0], sizes = [2, 32], strides = [1, 1]} : vector<2x128xf32> to vector<2x32xf32>
    %c0_48 = arith.constant 0 : index
    %c0_49 = arith.constant 0 : index
    %166 = vector.load %arg12[%c0_48, %c0_49] : memref<2x32xf32, #tpu.memory_space<vmem>>, vector<2x32xf32>
    tpu.vector_store %arg12[%c0_48, %c0_49], %165 {strides = array<i32>} : memref<2x32xf32, #tpu.memory_space<vmem>>, vector<2x32xf32>,
    return
  }
}

</mosaic_0001>

<bundles_post_ra>
// kernel: total_net_forward.1
= control target key start
LH: loop header
LB: loop body
LE: loop exit
PB: predicated region body
PF: predicated region fallthrough
CT: control target
= control target key end

     0   :  { %17 = vsyncpa [#allocation6], 0  ;;  %s1069_s0 = inlined_call_operand.vmem [shape: f32[21], index: 0, kind: input, shape index: {}]   ;;  %s1070_s1 = inlined_call_operand.vmem [shape: f32[2,32], index: 1, kind: input, shape index: {}]   ;;  %s1071_s2 = inlined_call_operand.vmem [shape: f32[16,5], index: 2, kind: input, shape index: {}]   ;;  %s1072_s3 = inlined_call_operand.vmem [shape: bf16[5,32], index: 3, kind: input, shape index: {}]   ;;  %s1073_s4 = inlined_call_operand.vmem [shape: f32[1,32], index: 4, kind: input, shape index: {}]   ;;  %s1074_s5 = inlined_call_operand.vmem [shape: bf16[32,128], index: 5, kind: input, shape index: {}]   ;;  %s1075_s6 = inlined_call_operand.vmem [shape: f32[1,128], index: 6, kind: input, shape index: {}]   ;;  %s1076_s7 = inlined_call_operand.vmem [shape: bf16[32,16], index: 7, kind: input, shape index: {}]   ;;  %s1077_s8 = inlined_call_operand.vmem [shape: f32[32,1], index: 8, kind: input, shape index: {}]   ;;  %s1078_s9 = inlined_call_operand.vmem [shape: bf16[2,32], index: 9, kind: input, shape index: {}]   ;;  %s1079_s10 = inlined_call_operand.hbm [shape: bf16[384,128], index: 10, kind: input, shape index: {}]   ;;  %s1080_s11 = inlined_call_operand.vmem [shape: f32[3,128], index: 11, kind: input, shape index: {}]   ;;  %s1081_s12 = inlined_call_operand.hbm [shape: f32[2,32], index: 12, kind: output, shape index: {}]  }
   0x1   :  { %18 = vsyncpa [#allocation4], 0 }
   0x2   :  { %19 = vsyncpa [#allocation5], 0  ;;  %s25_s23 = sshll.u32 %s1069_s0, 4  ;;  %s51_s26 = sshll.u32 %s1079_s10, 4  ;;  %s26_s23 = int_to_ptr.vmem [resolvable:$true] %s25_s23  ;;  %s52_s26 = int_to_ptr.hbm [resolvable:$true] %s51_s26 }
   0x3   :  { %s898_s27 = smov [#allocation3]   ;;  %s899_s28 = smov [#allocation7]  }
   0x4   :  { %28 = dma.vmem_to_smem %s26_s23, 16, %s898_s27, [#allocation6]  }
   0x5   :  { %s53_s29 = sshll.u32 %s899_s28, 4  ;;  %s900_s30 = smov 64   ;;  %s54_s29 = int_to_ptr.vmem [resolvable:$true] %s53_s29 }
   0x6   :  { %s901_s13 = smov 4  }
   0x7   :  { %59 = dma.hbm_to_vmem [thread:$0]  %s52_s26, 3072, %s54_s29, [#allocation4], %s900_s30, %s900_s30, %s901_s13  }
   0x8   :  { %892 = dma.done.wait [#allocation6], 16  }
   0x9   :  { %893 = vsyncadd [#allocation6], 4294967280 }
   0xa   :  { %894 = dma.done.wait [#allocation4], 3072  }
   0xb   :  { %895 = vsyncadd [#allocation4], 4294964224 }
   0xc   :  { %70 = sfence }
   0xd   :  { %v73_v0 = vld [vmem:[%s1070_s1] sm:$0x3]  ;;  %vm74_vm0 = vcmask 254976   ;;  %v902_v1 = vmov 0.0   ;;  %vm201_vm1 = vcmask 1041408   ;;  %vm202_vm2 = vcmask 1042432  }
   0xe   :  { %72 = vst [vmem:[#allocation2] sm:$0x3] %v902_v1  ;;  %v192_v2 = vld [vmem:[%s1072_s3] sm:$0x7]  ;;  %v903_v3 = vmov 65535   ;;  %v190_v6 = vld [vmem:[%s1071_s2 + $0x8] sm:$0xff]  ;;  %v77_v14 = vlaneseq }
   0xf   :  { %75 = vst.msk [vmem:[#allocation2] sm:$0x3] %vm74_vm0, %v73_v0  ;;  %v203_v4 = vsel %vm201_vm1, 4294967295, %v903_v3  ;;  %v189_v5 = vld [vmem:[%s1071_s2] sm:$0xff]  ;;  %vm197_vm3 = vcmask 39936   ;;  %s904_s1 = smov 1  }
  0x10   :  { %v204_v7 = vsel %vm202_vm2, %v203_v4, 0  ;;  %v191_v9 = vpack.c.bf16 %v190_v6, %v189_v5  ;;  %s616_s3 = sld [smem:[#allocation3 + $0x1]]  ;;  %v754_v11 = vld [vmem:[%s1074_s5 + $0x8] sm:$0xff]  ;;  %v753_v12 = vld [vmem:[%s1074_s5] sm:$0xff]  ;;  %v1012_v17 = vand.u32 127, %v77_v14  ;;  %s905_s26 = smov 127  }
  0x11   :  { %v206_v8 = vand.u32 %v204_v7, %v192_v2  ;;  %s81_s20 = sld [smem:[#allocation3]]  ;;  %255 = vmatpush.bf16.msra.mxu3 %v754_v11  ;;  %v802_v25 = vld [vmem:[%s1073_s4] ss:$0 sm:$0xff]  ;;  %vm245_vm5 = vcmask 261120   ;;  %vm302_vm7 = vcmask 130048   ;;  %v756_v50 = vld [vmem:[%s1076_s7 + $0x8] sm:$0xff] }
  0x12   :  { %s617_s24 = sld [smem:[#allocation3 + $0x2]]  ;;  %vm79_vm4 = vcmp.lt.s32.totalorder %v1012_v17, 33  ;;  %vm80_vm6 = vcmp.lt.s32.totalorder %v1012_v17, 32  ;;  %v803_v44 = vld [vmem:[%s1075_s6] ss:$0 sm:$0xff]  ;;  %v270_v51 = vld [vmem:[%s1077_s8 + $0x10] sm:$0xff] }
  0x13   :  { %215 = vmatpush.bf16.msra.mxu0 %v206_v8  ;;  %s618_s27 = sld [smem:[#allocation3 + $0x3]]  ;;  %v755_v49 = vld [vmem:[%s1076_s7] sm:$0xff]  ;;  %v906_v52 = vmov 0   ;;  %v271_v53 = vld [vmem:[%s1077_s8 + $0x18] sm:$0xff]  ;;  %v269_v55 = vld [vmem:[%s1077_s8 + $0x8] sm:$0xff]  ;;  %s908_s2 = smov 2  }
  0x14   :  { %s619_s28 = sld [smem:[#allocation3 + $0x4]]  ;;  %799 = vset.pattern.permute.xlu2 %v906_v52  ;;  %801 = vset.pattern.permute.xlu1 %v906_v52  ;;  %v268_v54 = vld [vmem:[%s1077_s8] sm:$0xff]  ;;  %s907_s8 = smov 126   ;;  %vm353_vm8 = vcmp.ge.s32.totalorder %v1012_v17, 32  ;;  %vm354_vm9 = vcmp.lt.s32.totalorder %v1012_v17, 39 }
  0x15   :  { %256 = vmatpush.bf16.msra.mxu3 %v753_v12  ;;  %s620_s29 = sld [smem:[#allocation3 + $0x5]]  ;;  %284 = vperm.xlu2 %799, %v270_v51   ;;  %s909_s25 = smov 124   ;;  %vm355_vm10 = vmand %vm353_vm8, %vm354_vm9  ;;  %v777_v17 = vld [vmem:[#allocation7 + $0xa0] sm:$0xff] }
  0x16   :  { %v1001_v10 = vld [vmem:[#allocation2] sm:$0x3]  ;;  %636 = vmatmul.msk.bf16.vlgmr.msra.gmra.mxu0 %vm197_vm3, %v191_v9  ;;  %v88_v13 = vstv %s616_s3  ;;  %800 = vset.pattern.permute.xlu0 %v906_v52  ;;  %s622_s21 = sld [smem:[#allocation3 + $0x7]]  ;;  %s912_s30 = smov 32  }
  0x17   :  { %84 = vrot.lane.b32.xlu0 %v1001_v10, %s904_s1  ;;  %v86_v15 = vstv %s81_s20  ;;  %v89_v16 = vmul.f32 %v88_v13, %v1001_v10  ;;  %s621_s20 = sld [smem:[#allocation3 + $0x6]]  ;;  %v760_v52 = vld [vmem:[#allocation7 + $0x18] sm:$0xff]  ;;  %s913_s15 = smov 112  }
  0x18   :  { %v91_v20 = vstv %s617_s24  ;;  %s623_s22 = sld [smem:[#allocation3 + $0x8]]  ;;  %s914_s16 = smov 16  }
  0x19   :  { %v100_v33 = vstv %s618_s27  ;;  %s624_s23 = sld [smem:[#allocation3 + $0x9]] }
  0x1a   :  { %v102_v34 = vstv %s619_s28  ;;  %s625_s24 = sld [smem:[#allocation3 + $0xa]] }
  0x1b   :  { %v105_v38 = vstv %s620_s29  ;;  %s626_s5 = sld [smem:[#allocation3 + $0xb]] }
  0x1c   :  { %v118_v58 = vstv %s622_s21  ;;  %s627_s28 = sld [smem:[#allocation3 + $0xc]]  ;;  %s605_s21 = sshll.u32 %s1081_s12, 4  ;;  %s606_s21 = int_to_ptr.hbm [resolvable:$true] %s605_s21 }
  0x1d   :  { %289 = vperm.xlu2 %799, %v271_v53   ;;  %v116_v57 = vstv %s621_s20  ;;  %s628_s29 = sld [smem:[#allocation3 + $0xd]] }
  0x1e   :  { %v121_v62 = vstv %s623_s22  ;;  %s629_s4 = sld [smem:[#allocation3 + $0xe]] }
  0x1f   :  { %s631_s0 = sld [smem:[#allocation3 + $0x10]] }
  0x20   :  { %s630_s14 = sld [smem:[#allocation3 + $0xf]] }
  0x21   :  { %s632_s10 = sld [smem:[#allocation3 + $0x11]] }
  0x22   :  { %s634_s17 = sld [smem:[#allocation3 + $0x13]] }
  0x23   :  { %s633_s6 = sld [smem:[#allocation3 + $0x12]] }
  0x24   :  { %s635_s18 = sld [smem:[#allocation3 + $0x14]] }
  0x25   :  { %v166_v53 = vstv %s631_s0 }
  0x6f   :  { %v285_v5 = vpop.permute.xlu2 %284 }
  0x77   :  { %v290_v8 = vpop.permute.xlu2 %289 }
  0x89   :  { %v85_v18 = vpop.permute.xlu0 %84 }
  0x8a   :  { %v87_v19 = vmul.f32 %v86_v15, %v85_v18 }
  0x8c   :  { %v90_v21 = vadd.f32 %v89_v16, %v87_v19 }
  0x8e   :  { %v92_v22 = vadd.f32 %v91_v20, %v90_v21 }
  0x90   :  { %v93_v23 = vsel %vm79_vm4, %v92_v22, 0.0 }
  0x91   :  { %804 = vtanh.f32 %v93_v23  ;;  %v132_v23 = vstv %s624_s23 }
  0x93   :  { %v217_v24 = vpop.f32.mrf.mxu0 }
  0x94   :  { %v218_v27 = vadd.f32 %v802_v25, %v217_v24 }
  0x96   :  { %806 = vtanh.f32 %v218_v27 }
  0x97   :  { %v805_v26 = vpop.eup %804 }
  0x98   :  { %98 = vrot.lane.b32.xlu0 %v805_v26, %s905_s26  ;;  %v101_v36 = vmul.f32 %v805_v26, %v100_v33 }
  0x9b   :  { %v219_v28 = vpop.f32.mrf.mxu0 }
  0x9c   :  { %v220_v29 = vadd.f32 %v802_v25, %v219_v28  ;;  %v807_v30 = vpop.eup %806  ;;  %v134_v25 = vstv %s625_s24 }
  0x9e   :  { %808 = vtanh.f32 %v220_v29  ;;  %v137_v29 = vstv %s626_s5 }
  0xa0   :  { %274 = vperm.xlu0 %800, %v268_v54  }
  0xa4   :  { %v809_v31 = vpop.eup %808 }
  0xa5   :  { %v224_v32 = vpack.c.bf16 %v809_v31, %v807_v30 }
  0xa7   :  { %645 = vmatmul.msk.bf16.vlgmr.msra.gmra.mxu3 %vm245_vm5, %v224_v32 }
 0x10a   :  { %v99_v35 = vpop.permute.xlu0 %98 }
 0x10b   :  { %v103_v37 = vmul.f32 %v102_v34, %v99_v35  ;;  %v328_v34 = vld [vmem:[%s1078_s9] sm:$0x1]  ;;  %v148_v35 = vstv %s627_s28  ;;  %s910_s9 = smov 120  }
 0x10d   :  { %v104_v39 = vadd.f32 %v103_v37, %v101_v36  ;;  %v150_v37 = vstv %s628_s29 }
 0x10f   :  { %v106_v40 = vadd.f32 %v105_v38, %v104_v39 }
 0x111   :  { %v107_v41 = vsel %vm80_vm6, %v106_v40, 0.0 }
 0x112   :  { %810 = vtanh.f32 %v107_v41  ;;  %v275_v15 = vpop.permute.xlu0 %274  ;;  %v153_v41 = vstv %s629_s4 }
 0x118   :  { %v811_v42 = vpop.eup %810 }
 0x119   :  { %112 = vrot.lane.b32.xlu1 %v811_v42, %s904_s1 }
 0x121   :  { %114 = vrot.lane.b32.xlu1 %v811_v42, %s905_s26 }
 0x129   :  { %279 = vperm.xlu1 %801, %v269_v55   ;;  %v164_v55 = vstv %s630_s14 }
 0x12a   :  { %v258_v43 = vpop.f32.mrf.mxu3 }
 0x12b   :  { %v259_v45 = vadd.f32 %v803_v44, %v258_v43 }
 0x132   :  { %v260_v46 = vpop.f32.mrf.mxu3 }
 0x133   :  { %v261_v47 = vadd.f32 %v803_v44, %v260_v46  ;;  %v764_v46 = vld [vmem:[#allocation7 + $0x38] sm:$0xff] }
 0x134   :  { %424 = vmatpush.bf16.msrb.mxu0 %v764_v46 }
 0x135   :  { %v267_v48 = vpack.c.bf16 %v261_v47, %v259_v45  ;;  %v763_v47 = vld [vmem:[#allocation7 + $0x30] sm:$0xff] }
 0x137   :  { %316 = vmatpush.bf16.msra.mxu2 %v267_v48 }
 0x138   :  { %425 = vmatpush.bf16.msrb.mxu0 %v763_v47 }
 0x13a   :  { %654 = vmatmul.msk.bf16.vlgmr.msra.gmra.mxu2 %vm302_vm7, %v755_v49  ;;  %v762_v49 = vld [vmem:[#allocation7 + $0x28] sm:$0xff] }
 0x13c   :  { %426 = vmatpush.bf16.msrb.mxu0 %v762_v49 }
 0x14a   :  { %655 = vmatmul.msk.bf16.gmra.mxu2 %vm302_vm7, %v756_v50  ;;  %v761_v50 = vld [vmem:[#allocation7 + $0x20] sm:$0xff] }
 0x14b   :  { %427 = vmatpush.bf16.msrb.mxu0 %v761_v50 }
 0x14f   :  { %428 = vmatpush.bf16.msrb.mxu0 %v760_v52 }
 0x18b   :  { %v113_v56 = vpop.permute.xlu1 %112 }
 0x18c   :  { %v117_v60 = vmul.f32 %v116_v57, %v113_v56 }
 0x193   :  { %v115_v59 = vpop.permute.xlu1 %114 }
 0x194   :  { %v119_v61 = vmul.f32 %v118_v58, %v115_v59  ;;  %v169_v59 = vstv %s632_s10 }
 0x196   :  { %v120_v63 = vadd.f32 %v119_v61, %v117_v60 }
 0x198   :  { %v122_v0 = vadd.f32 %v121_v62, %v120_v63 }
 0x19a   :  { %v123_v1 = vsel %vm80_vm6, %v122_v0, 0.0  ;;  %v759_v0 = vld [vmem:[#allocation7 + $0x10] sm:$0xff] }
 0x19b   :  { %812 = vtanh.f32 %v123_v1  ;;  %v280_v18 = vpop.permute.xlu1 %279  ;;  %429 = vmatpush.bf16.msrb.mxu0 %v759_v0  ;;  %v758_v1 = vld [vmem:[#allocation7 + $0x8] sm:$0xff] }
 0x19f   :  { %430 = vmatpush.bf16.msrb.mxu0 %v758_v1 }
 0x1a1   :  { %v813_v2 = vpop.eup %812 }
 0x1a2   :  { %130 = vrot.lane.b32.xlu1 %v813_v2, %s907_s8  ;;  %128 = vrot.lane.b32.xlu2 %v813_v2, %s908_s2  ;;  %v757_v2 = vld [vmem:[#allocation7] sm:$0xff] }
 0x1a3   :  { %431 = vmatpush.bf16.msrb.mxu0 %v757_v2 }
 0x1bd   :  { %v318_v3 = vpop.f32.mrf.mxu2 }
 0x1be   :  { %v319_v16 = vadd.f32 %v318_v3, %v275_v15  ;;  %v772_v3 = vld [vmem:[#allocation7 + $0x78] sm:$0xff]  ;;  %v185_v15 = vstv %s635_s18 }
 0x1bf   :  { %504 = vmatpush.bf16.msrb.mxu2 %v772_v3 }
 0x1c5   :  { %v320_v4 = vpop.f32.mrf.mxu2 }
 0x1c6   :  { %v321_v19 = vadd.f32 %v320_v4, %v280_v18  ;;  %v771_v4 = vld [vmem:[#allocation7 + $0x70] sm:$0xff] }
 0x1c7   :  { %505 = vmatpush.bf16.msrb.mxu2 %v771_v4 }
 0x1cd   :  { %v323_v6 = vpop.f32.mrf.mxu2 }
 0x1ce   :  { %v324_v7 = vadd.f32 %v323_v6, %v285_v5  ;;  %v770_v5 = vld [vmem:[#allocation7 + $0x68] sm:$0xff]  ;;  %v769_v6 = vld [vmem:[#allocation7 + $0x60] sm:$0xff] }
 0x1cf   :  { %506 = vmatpush.bf16.msrb.mxu2 %v770_v5 }
 0x1d0   :  { %814 = vtanh.f32 %v324_v7  ;;  %v768_v7 = vld [vmem:[#allocation7 + $0x58] sm:$0xff] }
 0x1d3   :  { %507 = vmatpush.bf16.msrb.mxu2 %v769_v6 }
 0x1d5   :  { %v325_v9 = vpop.f32.mrf.mxu2 }
 0x1d6   :  { %v326_v11 = vadd.f32 %v325_v9, %v290_v8  ;;  %v815_v12 = vpop.eup %814  ;;  %v182_v8 = vstv %s634_s17  ;;  %v180_v9 = vstv %s633_s6 }
 0x1d7   :  { %508 = vmatpush.bf16.msrb.mxu2 %v768_v7 }
 0x1d8   :  { %816 = vtanh.f32 %v326_v11 }
 0x1d9   :  { %818 = vtanh.f32 %v319_v16 }
 0x1da   :  { %820 = vtanh.f32 %v321_v19 }
 0x1de   :  { %v817_v13 = vpop.eup %816 }
 0x1df   :  { %v334_v14 = vpack.c.bf16 %v817_v13, %v815_v12  ;;  %v819_v20 = vpop.eup %818 }
 0x1e0   :  { %v821_v21 = vpop.eup %820 }
 0x1e1   :  { %344 = vmatpush.bf16.msrb.mxu3 %v334_v14  ;;  %v333_v22 = vpack.c.bf16 %v821_v21, %v819_v20 }
 0x1e5   :  { %345 = vmatpush.bf16.msrb.mxu3 %v333_v22 }
 0x1e8   :  { %656 = vmatmul.msk.bf16.vlgmr.msrb.gmra.mxu3 %vm245_vm5, %v328_v34 }
 0x1fc   :  { %v129_v24 = vpop.permute.xlu2 %128 }
 0x1fd   :  { %v133_v27 = vmul.f32 %v132_v23, %v129_v24  ;;  %v767_v24 = vld [vmem:[#allocation7 + $0x50] sm:$0xff] }
 0x1fe   :  { %509 = vmatpush.bf16.msrb.mxu2 %v767_v24 }
 0x214   :  { %v131_v26 = vpop.permute.xlu1 %130 }
 0x215   :  { %v135_v28 = vmul.f32 %v134_v25, %v131_v26  ;;  %v766_v25 = vld [vmem:[#allocation7 + $0x48] sm:$0xff]  ;;  %v765_v26 = vld [vmem:[#allocation7 + $0x40] sm:$0xff] }
 0x216   :  { %510 = vmatpush.bf16.msrb.mxu2 %v766_v25 }
 0x217   :  { %v136_v30 = vadd.f32 %v135_v28, %v133_v27  ;;  %v780_v27 = vld [vmem:[#allocation7 + $0xb8] sm:$0xff]  ;;  %v779_v28 = vld [vmem:[#allocation7 + $0xb0] sm:$0xff] }
 0x218   :  { %584 = vmatpush.bf16.msra.mxu1 %v780_v27 }
 0x219   :  { %v138_v31 = vadd.f32 %v137_v29, %v136_v30  ;;  %v778_v29 = vld [vmem:[#allocation7 + $0xa8] sm:$0xff]  ;;  %v776_v30 = vld [vmem:[#allocation7 + $0x98] sm:$0xff] }
 0x21a   :  { %511 = vmatpush.bf16.msrb.mxu2 %v765_v26 }
 0x21b   :  { %v139_v32 = vsel %vm80_vm6, %v138_v31, 0.0 }
 0x21c   :  { %822 = vtanh.f32 %v139_v32  ;;  %585 = vmatpush.bf16.msra.mxu1 %v779_v28 }
 0x220   :  { %586 = vmatpush.bf16.msra.mxu1 %v778_v29 }
 0x222   :  { %v823_v33 = vpop.eup %822 }
 0x223   :  { %146 = vrot.lane.b32.xlu0 %v823_v33, %s909_s25  ;;  %144 = vrot.lane.b32.xlu2 %v823_v33, %s901_s13  ;;  %s911_s13 = smov 8  }
 0x224   :  { %587 = vmatpush.bf16.msra.mxu1 %v777_v17 }
 0x228   :  { %588 = vmatpush.bf16.msra.mxu1 %v776_v30 }
 0x26b   :  { %v347_v48 = vpop.f32.mrf.mxu3 }
 0x273   :  { %v349_v51 = vpop.f32.mrf.mxu3 }
 0x27d   :  { %v145_v36 = vpop.permute.xlu2 %144 }
 0x27e   :  { %v149_v39 = vmul.f32 %v148_v35, %v145_v36 }
 0x295   :  { %v147_v38 = vpop.permute.xlu0 %146 }
 0x296   :  { %v151_v40 = vmul.f32 %v150_v37, %v147_v38  ;;  %v775_v37 = vld [vmem:[#allocation7 + $0x90] sm:$0xff]  ;;  %v774_v38 = vld [vmem:[#allocation7 + $0x88] sm:$0xff] }
 0x297   :  { %589 = vmatpush.bf16.msra.mxu1 %v775_v37 }
 0x298   :  { %v152_v42 = vadd.f32 %v151_v40, %v149_v39  ;;  %v773_v39 = vld [vmem:[#allocation7 + $0x80] sm:$0xff] }
 0x29a   :  { %v154_v43 = vadd.f32 %v153_v41, %v152_v42 }
 0x29b   :  { %590 = vmatpush.bf16.msra.mxu1 %v774_v38 }
 0x29c   :  { %v155_v44 = vsel %vm80_vm6, %v154_v43, 0.0 }
 0x29d   :  { %824 = vtanh.f32 %v155_v44 }
 0x29f   :  { %591 = vmatpush.bf16.msra.mxu1 %v773_v39 }
 0x2a3   :  { %v825_v45 = vpop.eup %824 }
 0x2a4   :  { %162 = vrot.lane.b32.xlu2 %v825_v45, %s910_s9  ;;  %160 = vrot.lane.b32.xlu1 %v825_v45, %s911_s13 }
 0x2ac   :  { %351 = vrot.lane.b32.xlu2 %v347_v48, %s912_s30 }
 0x2fe   :  { %v163_v54 = vpop.permute.xlu2 %162 }
 0x2ff   :  { %v167_v57 = vmul.f32 %v166_v53, %v163_v54 }
 0x306   :  { %v352_v20 = vpop.permute.xlu2 %351 }
 0x316   :  { %v161_v56 = vpop.permute.xlu1 %160 }
 0x317   :  { %v165_v58 = vmul.f32 %v164_v55, %v161_v56 }
 0x319   :  { %v168_v60 = vadd.f32 %v167_v57, %v165_v58 }
 0x31b   :  { %v170_v61 = vadd.f32 %v169_v59, %v168_v60 }
 0x31d   :  { %v171_v62 = vsel %vm80_vm6, %v170_v61, 0.0 }
 0x31e   :  { %826 = vtanh.f32 %v171_v62 }
 0x324   :  { %v827_v63 = vpop.eup %826 }
 0x325   :  { %178 = vrot.lane.b32.xlu1 %v827_v63, %s913_s15  ;;  %176 = vrot.lane.b32.xlu0 %v827_v63, %s914_s16 }
 0x397   :  { %v179_v11 = vpop.permute.xlu1 %178  ;;  %v177_v12 = vpop.permute.xlu0 %176 }
 0x398   :  { %v183_v13 = vmul.f32 %v182_v8, %v179_v11  ;;  %v181_v14 = vmul.f32 %v180_v9, %v177_v12 }
 0x39a   :  { %v184_v16 = vadd.f32 %v183_v13, %v181_v14 }
 0x39c   :  { %v186_v18 = vadd.f32 %v185_v15, %v184_v16 }
 0x39e   :  { %v187_v19 = vsel %vm80_vm6, %v186_v18, 0.0 }
 0x39f   :  { %v188_v21 = vadd.f32 %v187_v19, %v1001_v10  ;;  %v357_v10 = vld [vmem:[%s1080_s11] sm:$0x7]  ;;  %s915_s11 = smov [#allocation8]  }
 0x3a0   :  { %v375_v31 = vperm.slane %v357_v10, 0  ;;  %v455_v40 = vperm.slane %v357_v10, 1  ;;  %v535_v46 = vperm.slane %v357_v10, 2  ;;  %s603_s3 = sshll.u32 %s915_s11, 4  ;;  %s604_s3 = int_to_ptr.vmem [resolvable:$true] %s603_s3 }
 0x3a1   :  { %v356_v22 = vsel %vm355_vm10, %v352_v20, %v188_v21 }
 0x3a2   :  { %v358_v23 = vpack.c.bf16 %v356_v22, %v356_v22 }
 0x3a4   :  { %432 = vmatmul.bf16.vlgmr.msrb.gmra.mxu0 %v358_v23 }
 0x421   :  { %v433_v32 = vpop.f32.mrf.mxu0 }
 0x422   :  { %v434_v33 = vadd.f32 %v433_v32, %v375_v31 }
 0x424   :  { %828 = vtanh.f32 %v434_v33 }
 0x429   :  { %v435_v34 = vpop.f32.mrf.mxu0 }
 0x42a   :  { %v829_v35 = vpop.eup %828 }
 0x42b   :  { %v438_v36 = vpack.c.bf16 %v829_v35, %v829_v35 }
 0x42d   :  { %512 = vmatmul.bf16.vlgmr.msrb.gmra.mxu2 %v438_v36 }
 0x4b0   :  { %v513_v41 = vpop.f32.mrf.mxu2 }
 0x4b1   :  { %v514_v42 = vadd.f32 %v513_v41, %v455_v40 }
 0x4b3   :  { %830 = vtanh.f32 %v514_v42 }
 0x4b8   :  { %v515_v43 = vpop.f32.mrf.mxu2 }
 0x4b9   :  { %v831_v44 = vpop.eup %830 }
 0x4ba   :  { %v518_v45 = vpack.c.bf16 %v831_v44, %v831_v44 }
 0x4bc   :  { %592 = vmatmul.bf16.vlgmr.msra.gmra.mxu1 %v518_v45 }
 0x539   :  { %v593_v47 = vpop.f32.mrf.mxu1 }
 0x53a   :  { %v594_v48 = vadd.f32 %v593_v47, %v535_v46 }
 0x53c   :  { %597 = vst.msk [vmem:[#allocation8] sm:$0x3] %vm74_vm0, %v594_v48 }
 0x53d   :  { %608 = dma.vmem_to_hbm [thread:$0]  %s604_s3, 32, %s606_s21, [#allocation5]  }
 0x541   :  { %v595_v49 = vpop.f32.mrf.mxu1 }
 0x542   :  { %896 = dma.done.wait [#allocation5], 32  }
 0x543   :  { %897 = vsyncadd [#allocation5], 4294967264 }
 0x544   :  { %613 = vsyncpa [#allocation4], 1 }
 0x545   :  { %614 = vsyncpa [#allocation5], 1 }
 0x546   :  { %615 = vsyncpa [#allocation6], 1 }

</bundles_post_ra>
